<compile_context>
chip_gen: v7x
topology: tpu7x:2x2x1
jax: 0.10.0
libtpu: 0.0.40
codegen_flags: <defaults>
</compile_context>

<pallas_src>
import functools
import math

import jax
import jax.numpy as jnp
from jax.experimental import pallas as pl
from jax.experimental.pallas import tpu as pltpu

LN2 = math.log(2.0)
INV_LN2 = 1.0 / LN2
LOG2_EPS = math.log2(1e-10)          # matches torch.clamp(p, 1e-10, 1.0)


# -----------------------------------------------------------------------------
# Kernel 1: entropy / varentropy of the logits (online log-softmax over vocab
# tiles).  With z = x - running_max:
#   entropy_bits    = (log(S) - E[z]) / ln2
#   varentropy_bits = Var(z) / ln2^2  =  (E[z^2] - E[z]^2) / ln2^2
# -----------------------------------------------------------------------------
def _varentropy_kernel(x_ref, ent_ref, vent_ref, m_s, s_s, a1_s, a2_s,
                       *, V, TV, KV):
    k = pl.program_id(0)

    @pl.when(k == 0)
    def _():
        m_s[...] = jnp.full_like(m_s, -jnp.inf)
        s_s[...] = jnp.zeros_like(s_s)
        a1_s[...] = jnp.zeros_like(a1_s)
        a2_s[...] = jnp.zeros_like(a2_s)

    x = x_ref[...].astype(jnp.float32)                    # (B, TV)

    needs_mask = (V % TV) != 0
    if needs_mask:
        col = jax.lax.broadcasted_iota(jnp.int32, (1, TV), 1) + k * TV
        valid = col < V                                   # (1, TV)
        x_for_max = jnp.where(valid, x, -jnp.inf)
    else:
        valid = None
        x_for_max = x

    m_old = m_s[...]                                      # (B, 1)
    s_old = s_s[...]
    a1_old = a1_s[...]
    a2_old = a2_s[...]

    m_tile = jnp.max(x_for_max, axis=-1, keepdims=True)   # (B, 1)
    m_new = jnp.maximum(m_old, m_tile)
    d = m_new - m_old                                     # >= 0 (+inf on 1st tile)
    c = jnp.exp(-d)                                       # 0 on first tile

    # Rescale previous accumulators to the new running max.
    # Guards avoid inf*0 on the very first tile (s_old == 0).
    adj1 = jnp.where(s_old > 0, d * s_old, 0.0)
    adj2 = jnp.where(s_old > 0, 2.0 * d * a1_old - d * d * s_old, 0.0)
    s_r = c * s_old
    a1_r = c * (a1_old - adj1)
    a2_r = c * (a2_old - adj2)

    z = x - m_new                                         # (B, TV)
    e = jnp.exp(z)                                        # single exp / element
    if needs_mask:
        e = jnp.where(valid, e, 0.0)
        z = jnp.where(valid, z, 0.0)
    ez = e * z

    s_s[...] = s_r + jnp.sum(e, axis=-1, keepdims=True)
    a1_s[...] = a1_r + jnp.sum(ez, axis=-1, keepdims=True)
    a2_s[...] = a2_r + jnp.sum(ez * z, axis=-1, keepdims=True)
    m_s[...] = m_new

    @pl.when(k == KV - 1)
    def _():
        s = s_s[...]
        ez1 = a1_s[...] / s                               # E[z]
        ez2 = a2_s[...] / s                               # E[z^2]
        ent_ref[...] = (jnp.log(s) - ez1) * INV_LN2
        vent_ref[...] = (ez2 - ez1 * ez1) * (INV_LN2 * INV_LN2)


def calculate_varentropy_logsoftmax(logits, *, vocab_tile=8192):
    """logits: [B, V] float -> (entropy [B], varentropy [B]) in bits."""
    B, V = logits.shape
    assert vocab_tile % 128 == 0
    TV = V if V <= vocab_tile else vocab_tile
    KV = pl.cdiv(V, TV)
    kernel = functools.partial(_varentropy_kernel, V=V, TV=TV, KV=KV)
    ent, vent = pl.pallas_call(
        kernel,
        out_shape=(jax.ShapeDtypeStruct((B, 1), jnp.float32),
                   jax.ShapeDtypeStruct((B, 1), jnp.float32)),
        grid_spec=pltpu.PrefetchScalarGridSpec(
            num_scalar_prefetch=0,
            grid=(KV,),
            in_specs=[pl.BlockSpec((B, TV), lambda k: (0, k))],
            out_specs=(pl.BlockSpec((B, 1), lambda k: (0, 0)),
                       pl.BlockSpec((B, 1), lambda k: (0, 0))),
            scratch_shapes=[pltpu.VMEM((B, 1), jnp.float32)] * 4),
        compiler_params=pltpu.CompilerParams(
            dimension_semantics=("arbitrary",)),
    )(logits)
    return ent[:, 0], vent[:, 0]


# -----------------------------------------------------------------------------
# Kernel 2: per-layer attention metrics over the current-token attention row,
# tiled over K with a two-phase grid (grid = (L, 2*KT)):
#   pass 1 (j <  KT): online max / softmax normalizer, sum|a| (interaction)
#   pass 2 (j >= KT): p = exp(a - lse); entropy with clamped algebraic log2;
#                     agreement = mean |p - mean_heads(p)|
# -----------------------------------------------------------------------------
def _attn_metrics_kernel(attn_ref, ent_ref, vent_ref, agree_ref, inter_ref,
                         m_s, s_s, lse_s, ent_s, agree_s, inter_s,
                         *, K, TK, KT, H):
    j = pl.program_id(1)
    a = attn_ref[0].astype(jnp.float32)                   # (B, H, TK)
    B = a.shape[0]

    needs_mask = (K % TK) != 0
    if needs_mask:
        kb = (j % KT) * TK
        col = jax.lax.broadcasted_iota(jnp.int32, (1, 1, TK), 2) + kb
        valid = col < K                                   # (1, 1, TK)
    else:
        valid = None

    @pl.when(j == 0)
    def _():
        m_s[...] = jnp.full_like(m_s, -jnp.inf)
        s_s[...] = jnp.zeros_like(s_s)
        ent_s[...] = jnp.zeros_like(ent_s)
        agree_s[...] = jnp.zeros_like(agree_s)
        inter_s[...] = jnp.zeros_like(inter_s)

    # ---- pass 1: running max, softmax normalizer, interaction |a| sum ----
    @pl.when(j < KT)
    def _():
        if needs_mask:
            a_max_in = jnp.where(valid, a, -jnp.inf)
            a_abs = jnp.where(valid, jnp.abs(a), 0.0)
        else:
            a_max_in = a
            a_abs = jnp.abs(a)
        m_old = m_s[...]                                  # (B, H)
        m_new = jnp.maximum(m_old, jnp.max(a_max_in, axis=-1))
        c = jnp.exp(m_old - m_new)                        # 0 on first tile
        e = jnp.exp(a - m_new[..., None])
        if needs_mask:
            e = jnp.where(valid, e, 0.0)
        s_s[...] = c * s_s[...] + jnp.sum(e, axis=-1)
        m_s[...] = m_new
        inter_s[...] = inter_s[...] + jnp.sum(a_abs)

    # ---- end of pass 1: log-sum-exp + interaction strength ----
    @pl.when(j == KT - 1)
    def _():
        lse_s[...] = m_s[...] + jnp.log(s_s[...])
        inter_ref[...] = (inter_s[...] / float(B * H * K)).reshape(1, 1, 1)

    # ---- pass 2: entropy (clamped algebraic log2) + agreement ----
    @pl.when(j >= KT)
    def _():
        lse = lse_s[...]                                  # (B, H)
        lp = a - lse[..., None]                           # ln p
        p = jnp.exp(lp)
        logp2 = jnp.maximum(lp * INV_LN2, LOG2_EPS)       # == log2(clip(p,1e-10,1))
        if needs_mask:
            p = jnp.where(valid, p, 0.0)
            logp2 = jnp.where(valid, logp2, 0.0)
        ent_s[...] = ent_s[...] - jnp.sum(p * logp2, axis=-1)     # (B, H) bits
        p_bar = jnp.mean(p, axis=1, keepdims=True)                # (B, 1, TK)
        pa = jnp.sum(jnp.abs(p - p_bar), axis=(1, 2))             # (B,)
        agree_s[...] = agree_s[...] + pa[:, None]

    # ---- end of pass 2: write per-layer outputs ----
    @pl.when(j == 2 * KT - 1)
    def _():
        ent = ent_s[...]                                  # (B, H)
        ent_ref[...] = ent[None]
        mh = jnp.mean(ent, axis=-1, keepdims=True)
        vent_ref[...] = jnp.mean((ent - mh) ** 2, axis=-1)[None, None, :]
        agree_vec = jnp.sum(agree_s[...], axis=-1) / float(H * K)  # (B,)
        agree_ref[...] = agree_vec[None, None, :]


def attention_metrics(current_token_attn, *, key_tile=2048):
    """current_token_attn: [L, B, H, K] -> per-layer metric arrays."""
    L, B, H, K = current_token_attn.shape
    assert key_tile % 128 == 0
    TK = K if K <= key_tile else key_tile
    KT = pl.cdiv(K, TK)
    kernel = functools.partial(_attn_metrics_kernel, K=K, TK=TK, KT=KT, H=H)
    ent, vent, agree, inter = pl.pallas_call(
        kernel,
        out_shape=(jax.ShapeDtypeStruct((L, B, H), jnp.float32),
                   jax.ShapeDtypeStruct((L, 1, B), jnp.float32),
                   jax.ShapeDtypeStruct((L, 1, B), jnp.float32),
                   jax.ShapeDtypeStruct((L, 1, 1), jnp.float32)),
        grid_spec=pltpu.PrefetchScalarGridSpec(
            num_scalar_prefetch=0,
            grid=(L, 2 * KT),
            in_specs=[pl.BlockSpec((1, B, H, TK),
                                   lambda l, j: (l, 0, 0, j % KT))],
            out_specs=(pl.BlockSpec((1, B, H), lambda l, j: (l, 0, 0)),
                       pl.BlockSpec((1, 1, B), lambda l, j: (l, 0, 0)),
                       pl.BlockSpec((1, 1, B), lambda l, j: (l, 0, 0)),
                       pl.BlockSpec((1, 1, 1), lambda l, j: (l, 0, 0))),
            scratch_shapes=[pltpu.VMEM((B, H), jnp.float32),   # running max
                            pltpu.VMEM((B, H), jnp.float32),   # running sum exp
                            pltpu.VMEM((B, H), jnp.float32),   # lse
                            pltpu.VMEM((B, H), jnp.float32),   # entropy acc
                            pltpu.VMEM((B, 1), jnp.float32),   # agreement acc
                            pltpu.VMEM((1, 1), jnp.float32)]), # |a| acc
        compiler_params=pltpu.CompilerParams(
            dimension_semantics=("parallel", "arbitrary")),
    )(current_token_attn)
    return ent, vent[:, 0, :], agree[:, 0, :], inter[:, 0, 0]


# -----------------------------------------------------------------------------
# calculate_metrics: glue around the two kernels (final scalar means in JAX)
# -----------------------------------------------------------------------------
def calculate_metrics(logits, attention_scores, *, vocab_tile=8192,
                      key_tile=2048):
    """logits: [B, V]; attention_scores: list of L arrays [B, H, Q, K]."""
    entropy, varentropy = calculate_varentropy_logsoftmax(
        logits, vocab_tile=vocab_tile)

    # Slice the last query row BEFORE stacking: avoids staging [L,B,H,Q,K].
    current_token_attn = jnp.stack(
        [a[:, :, -1, :] for a in attention_scores], axis=0)      # [L, B, H, K]
    attn_ent, attn_vent, agree, inter = attention_metrics(
        current_token_attn, key_tile=key_tile)

    return {
        "logits_entropy": jnp.mean(entropy),
        "logits_varentropy": jnp.mean(varentropy),
        "attn_entropy": jnp.mean(attn_ent),
        "attn_varentropy": jnp.mean(attn_vent),
        "agreement": jnp.mean(agree),
        "interaction_strength": jnp.mean(inter),
    }


# -----------------------------------------------------------------------------
# Pure-JAX reference (for a correctness check)
# -----------------------------------------------------------------------------
def _reference_metrics(logits, attention_scores):
    log_probs = jax.nn.log_softmax(logits, axis=-1)
    probs = jnp.exp(log_probs)
    entropy = -jnp.sum(probs * log_probs, axis=-1) / LN2
    varentropy = jnp.sum(probs * (log_probs / LN2 + entropy[..., None]) ** 2,
                         axis=-1)

    attn_scores = jnp.stack(attention_scores, axis=0)
    cur = attn_scores[:, :, :, -1, :]                            # [L, B, H, K]
    p = jax.nn.softmax(cur, axis=-1)
    attn_ent = -jnp.sum(p * jnp.log2(jnp.clip(p, 1e-10, 1.0)), axis=-1)
    attn_vent = jnp.var(attn_ent, axis=-1)                       # over heads
    mean_attn = jnp.mean(p, axis=2, keepdims=True)
    agree = jnp.mean(jnp.abs(p - mean_attn), axis=(2, 3))        # [L, B]
    inter = jnp.mean(jnp.abs(cur), axis=(1, 2, 3))               # [L]

    return {
        "logits_entropy": jnp.mean(entropy),
        "logits_varentropy": jnp.mean(varentropy),
        "attn_entropy": jnp.mean(attn_ent),
        "attn_varentropy": jnp.mean(attn_vent),
        "agreement": jnp.mean(agree),
        "interaction_strength": jnp.mean(inter),
    }


if __name__ == "__main__":
    # Small configs; the tile parameters are shrunk so the multi-tile online
    # paths (and the masked partial-tile path) are actually exercised.
    #           B   V   L  H  Q   K   vocab_tile key_tile
    configs = [(2, 256, 3, 4, 8, 256, 128, 128),   # evenly tiled vocab & K
               (2, 200, 3, 4, 8, 200, 128, 128)]   # masked partial last tiles

    for (B, V, L, H, Q, K, vt, kt) in configs:
        key = jax.random.PRNGKey(0)
        k_logits, k_attn = jax.random.split(key)
        logits = jax.random.normal(k_logits, (B, V), dtype=jnp.float32)
        attn_keys = jax.random.split(k_attn, L)
        attention_scores = [
            jax.random.normal(attn_keys[i], (B, H, Q, K), dtype=jnp.float32)
            for i in range(L)
        ]

        metrics = calculate_metrics(logits, attention_scores,
                                    vocab_tile=vt, key_tile=kt)
        metrics = jax.tree_util.tree_map(jax.block_until_ready, metrics)

        ref = _reference_metrics(logits, attention_scores)
        for name in metrics:
            got = float(metrics[name])
            want = float(ref[name])
            assert abs(got - want) <= 1e-4 + 1e-4 * abs(want), (
                f"mismatch in {name} for cfg {(B, V, L, H, Q, K)}: "
                f"{got} vs {want}")

    print("KERNEL_OK")
</pallas_src>

<mosaic_0001>
module attributes {stable_mosaic.version = 11 : i64} {
  func.func @_varentropy_kernel(%arg0: i32, %arg1: memref<2x128xf32, #tpu.memory_space<vmem>>, %arg2: memref<2x1xf32, #tpu.memory_space<vmem>>, %arg3: memref<2x1xf32, #tpu.memory_space<vmem>>, %arg4: memref<2x1xf32, #tpu.memory_space<vmem>>, %arg5: memref<2x1xf32, #tpu.memory_space<vmem>>, %arg6: memref<2x1xf32, #tpu.memory_space<vmem>>, %arg7: memref<2x1xf32, #tpu.memory_space<vmem>>) attributes {dimension_semantics = [#tpu.dimension_semantics<arbitrary>], iteration_bounds = array<i64: 2>, scalar_prefetch = 0 : i64, scratch_operands = 4 : i64, tpu.core_type = #tpu.core_type<tc>, window_params = [{transform_indices = @transform_0, window_bounds = array<i64: 2, 128>}, {pipeline_mode = #tpu.pipeline_mode<synchronous>, transform_indices = @transform_1, window_bounds = array<i64: 2, 1>}, {pipeline_mode = #tpu.pipeline_mode<synchronous>, transform_indices = @transform_2, window_bounds = array<i64: 2, 1>}]} {
    %c0_i32 = arith.constant 0 : i32
    %0 = arith.cmpi eq, %arg0, %c0_i32 : i32
    %1 = arith.extui %0 : i1 to i32
    %c0_i32_0 = arith.constant 0 : i32
    %2 = arith.cmpi ne, %1, %c0_i32_0 : i32
    scf.if %2 {
      %cst_28 = arith.constant 0xFF800000 : f32
      %56 = vector.broadcast %cst_28 : f32 to vector<2x1xf32>
      %c0_29 = arith.constant 0 : index
      %c0_30 = arith.constant 0 : index
      %57 = vector.load %arg4[%c0_29, %c0_30] : memref<2x1xf32, #tpu.memory_space<vmem>>, vector<2x1xf32>
      tpu.vector_store %arg4[%c0_29, %c0_30], %56 {strides = array<i32>} : memref<2x1xf32, #tpu.memory_space<vmem>>, vector<2x1xf32>,
      %cst_31 = arith.constant 0.000000e+00 : f32
      %58 = vector.broadcast %cst_31 : f32 to vector<2x1xf32>
      %c0_32 = arith.constant 0 : index
      %c0_33 = arith.constant 0 : index
      %59 = vector.load %arg5[%c0_32, %c0_33] : memref<2x1xf32, #tpu.memory_space<vmem>>, vector<2x1xf32>
      tpu.vector_store %arg5[%c0_32, %c0_33], %58 {strides = array<i32>} : memref<2x1xf32, #tpu.memory_space<vmem>>, vector<2x1xf32>,
      %cst_34 = arith.constant 0.000000e+00 : f32
      %60 = vector.broadcast %cst_34 : f32 to vector<2x1xf32>
      %c0_35 = arith.constant 0 : index
      %c0_36 = arith.constant 0 : index
      %61 = vector.load %arg6[%c0_35, %c0_36] : memref<2x1xf32, #tpu.memory_space<vmem>>, vector<2x1xf32>
      tpu.vector_store %arg6[%c0_35, %c0_36], %60 {strides = array<i32>} : memref<2x1xf32, #tpu.memory_space<vmem>>, vector<2x1xf32>,
      %cst_37 = arith.constant 0.000000e+00 : f32
      %62 = vector.broadcast %cst_37 : f32 to vector<2x1xf32>
      %c0_38 = arith.constant 0 : index
      %c0_39 = arith.constant 0 : index
      %63 = vector.load %arg7[%c0_38, %c0_39] : memref<2x1xf32, #tpu.memory_space<vmem>>, vector<2x1xf32>
      tpu.vector_store %arg7[%c0_38, %c0_39], %62 {strides = array<i32>} : memref<2x1xf32, #tpu.memory_space<vmem>>, vector<2x1xf32>,
    } else {
    }
    %c0 = arith.constant 0 : index
    %c0_1 = arith.constant 0 : index
    %3 = vector.load %arg1[%c0, %c0_1] : memref<2x128xf32, #tpu.memory_space<vmem>>, vector<2x128xf32>
    %c0_2 = arith.constant 0 : index
    %c0_3 = arith.constant 0 : index
    %4 = vector.load %arg4[%c0_2, %c0_3] : memref<2x1xf32, #tpu.memory_space<vmem>>, vector<2x1xf32>
    %c0_4 = arith.constant 0 : index
    %c0_5 = arith.constant 0 : index
    %5 = vector.load %arg5[%c0_4, %c0_5] : memref<2x1xf32, #tpu.memory_space<vmem>>, vector<2x1xf32>
    %c0_6 = arith.constant 0 : index
    %c0_7 = arith.constant 0 : index
    %6 = vector.load %arg6[%c0_6, %c0_7] : memref<2x1xf32, #tpu.memory_space<vmem>>, vector<2x1xf32>
    %c0_8 = arith.constant 0 : index
    %c0_9 = arith.constant 0 : index
    %7 = vector.load %arg7[%c0_8, %c0_9] : memref<2x1xf32, #tpu.memory_space<vmem>>, vector<2x1xf32>
    %cst = arith.constant dense<0xFF800000> : vector<2xf32>
    %8 = vector.multi_reduction <maximumf>, %3, %cst [1] : vector<2x128xf32> to vector<2xf32>
    %9 = vector.shape_cast %8 : vector<2xf32> to vector<2x1xf32>
    %10 = arith.maximumf %4, %9 : vector<2x1xf32>
    %11 = arith.subf %10, %4 : vector<2x1xf32>
    %cst_10 = arith.constant 0.000000e+00 : f32
    %12 = vector.broadcast %cst_10 : f32 to vector<2x1xf32>
    %13 = arith.subf %12, %11 : vector<2x1xf32>
    %14 = math.exp %13 : vector<2x1xf32>
    %cst_11 = arith.constant 0.000000e+00 : f32
    %15 = vector.broadcast %cst_11 : f32 to vector<2x1xf32>
    %16 = arith.cmpf ogt, %5, %15 : vector<2x1xf32>
    %17 = arith.mulf %11, %5 : vector<2x1xf32>
    %cst_12 = arith.constant 0.000000e+00 : f32
    %18 = vector.broadcast %cst_12 : f32 to vector<2x1xf32>
    %19 = arith.select %16, %17, %18 : vector<2x1xi1>, vector<2x1xf32>
    %cst_13 = arith.constant 0.000000e+00 : f32
    %20 = vector.broadcast %cst_13 : f32 to vector<2x1xf32>
    %21 = arith.cmpf ogt, %5, %20 : vector<2x1xf32>
    %cst_14 = arith.constant 2.000000e+00 : f32
    %22 = vector.broadcast %cst_14 : f32 to vector<2x1xf32>
    %23 = arith.mulf %22, %11 : vector<2x1xf32>
    %24 = arith.mulf %23, %6 : vector<2x1xf32>
    %25 = arith.mulf %11, %11 : vector<2x1xf32>
    %26 = arith.mulf %25, %5 : vector<2x1xf32>
    %27 = arith.subf %24, %26 : vector<2x1xf32>
    %cst_15 = arith.constant 0.000000e+00 : f32
    %28 = vector.broadcast %cst_15 : f32 to vector<2x1xf32>
    %29 = arith.select %21, %27, %28 : vector<2x1xi1>, vector<2x1xf32>
    %30 = arith.mulf %14, %5 : vector<2x1xf32>
    %31 = arith.subf %6, %19 : vector<2x1xf32>
    %32 = arith.mulf %14, %31 : vector<2x1xf32>
    %33 = arith.subf %7, %29 : vector<2x1xf32>
    %34 = arith.mulf %14, %33 : vector<2x1xf32>
    %35 = vector.broadcast %10 : vector<2x1xf32> to vector<2x128xf32>
    %36 = arith.subf %3, %35 : vector<2x128xf32>
    %37 = math.exp %36 : vector<2x128xf32>
    %38 = arith.mulf %37, %36 : vector<2x128xf32>
    %cst_16 = arith.constant dense<0.000000e+00> : vector<2xf32>
    %39 = vector.multi_reduction <add>, %37, %cst_16 [1] : vector<2x128xf32> to vector<2xf32>
    %40 = vector.shape_cast %39 : vector<2xf32> to vector<2x1xf32>
    %41 = arith.addf %30, %40 : vector<2x1xf32>
    %c0_17 = arith.constant 0 : index
    %c0_18 = arith.constant 0 : index
    %42 = vector.load %arg5[%c0_17, %c0_18] : memref<2x1xf32, #tpu.memory_space<vmem>>, vector<2x1xf32>
    tpu.vector_store %arg5[%c0_17, %c0_18], %41 {strides = array<i32>} : memref<2x1xf32, #tpu.memory_space<vmem>>, vector<2x1xf32>,
    %cst_19 = arith.constant dense<0.000000e+00> : vector<2xf32>
    %43 = vector.multi_reduction <add>, %38, %cst_19 [1] : vector<2x128xf32> to vector<2xf32>
    %44 = vector.shape_cast %43 : vector<2xf32> to vector<2x1xf32>
    %45 = arith.addf %32, %44 : vector<2x1xf32>
    %c0_20 = arith.constant 0 : index
    %c0_21 = arith.constant 0 : index
    %46 = vector.load %arg6[%c0_20, %c0_21] : memref<2x1xf32, #tpu.memory_space<vmem>>, vector<2x1xf32>
    tpu.vector_store %arg6[%c0_20, %c0_21], %45 {strides = array<i32>} : memref<2x1xf32, #tpu.memory_space<vmem>>, vector<2x1xf32>,
    %47 = arith.mulf %38, %36 : vector<2x128xf32>
    %cst_22 = arith.constant dense<0.000000e+00> : vector<2xf32>
    %48 = vector.multi_reduction <add>, %47, %cst_22 [1] : vector<2x128xf32> to vector<2xf32>
    %49 = vector.shape_cast %48 : vector<2xf32> to vector<2x1xf32>
    %50 = arith.addf %34, %49 : vector<2x1xf32>
    %c0_23 = arith.constant 0 : index
    %c0_24 = arith.constant 0 : index
    %51 = vector.load %arg7[%c0_23, %c0_24] : memref<2x1xf32, #tpu.memory_space<vmem>>, vector<2x1xf32>
    tpu.vector_store %arg7[%c0_23, %c0_24], %50 {strides = array<i32>} : memref<2x1xf32, #tpu.memory_space<vmem>>, vector<2x1xf32>,
    %c0_25 = arith.constant 0 : index
    %c0_26 = arith.constant 0 : index
    %52 = vector.load %arg4[%c0_25, %c0_26] : memref<2x1xf32, #tpu.memory_space<vmem>>, vector<2x1xf32>
    tpu.vector_store %arg4[%c0_25, %c0_26], %10 {strides = array<i32>} : memref<2x1xf32, #tpu.memory_space<vmem>>, vector<2x1xf32>,
    %c1_i32 = arith.constant 1 : i32
    %53 = arith.cmpi eq, %arg0, %c1_i32 : i32
    %54 = arith.extui %53 : i1 to i32
    %c0_i32_27 = arith.constant 0 : i32
    %55 = arith.cmpi ne, %54, %c0_i32_27 : i32
    scf.if %55 {
      %c0_28 = arith.constant 0 : index
      %c0_29 = arith.constant 0 : index
      %56 = vector.load %arg5[%c0_28, %c0_29] : memref<2x1xf32, #tpu.memory_space<vmem>>, vector<2x1xf32>
      %c0_30 = arith.constant 0 : index
      %c0_31 = arith.constant 0 : index
      %57 = vector.load %arg6[%c0_30, %c0_31] : memref<2x1xf32, #tpu.memory_space<vmem>>, vector<2x1xf32>
      %58 = arith.divf %57, %56 : vector<2x1xf32>
      %c0_32 = arith.constant 0 : index
      %c0_33 = arith.constant 0 : index
      %59 = vector.load %arg7[%c0_32, %c0_33] : memref<2x1xf32, #tpu.memory_space<vmem>>, vector<2x1xf32>
      %60 = arith.divf %59, %56 : vector<2x1xf32>
      %61 = math.log %56 : vector<2x1xf32>
      %62 = arith.subf %61, %58 : vector<2x1xf32>
      %cst_34 = arith.constant 1.44269502 : f32
      %63 = vector.broadcast %cst_34 : f32 to vector<2x1xf32>
      %64 = arith.mulf %62, %63 : vector<2x1xf32>
      %c0_35 = arith.constant 0 : index
      %c0_36 = arith.constant 0 : index
      %65 = vector.load %arg2[%c0_35, %c0_36] : memref<2x1xf32, #tpu.memory_space<vmem>>, vector<2x1xf32>
      tpu.vector_store %arg2[%c0_35, %c0_36], %64 {strides = array<i32>} : memref<2x1xf32, #tpu.memory_space<vmem>>, vector<2x1xf32>,
      %66 = arith.mulf %58, %58 : vector<2x1xf32>
      %67 = arith.subf %60, %66 : vector<2x1xf32>
      %cst_37 = arith.constant 2.08136892 : f32
      %68 = vector.broadcast %cst_37 : f32 to vector<2x1xf32>
      %69 = arith.mulf %67, %68 : vector<2x1xf32>
      %c0_38 = arith.constant 0 : index
      %c0_39 = arith.constant 0 : index
      %70 = vector.load %arg3[%c0_38, %c0_39] : memref<2x1xf32, #tpu.memory_space<vmem>>, vector<2x1xf32>
      tpu.vector_store %arg3[%c0_38, %c0_39], %69 {strides = array<i32>} : memref<2x1xf32, #tpu.memory_space<vmem>>, vector<2x1xf32>,
    } else {
    }
    return
  }
  func.func @transform_0(%arg0: i32) -> (i32, i32) {
    %c0_i32 = arith.constant 0 : i32
    %c0_i32_0 = arith.constant 0 : i32
    return %c0_i32, %arg0 : i32, i32
  }
  func.func @transform_1(%arg0: i32) -> (i32, i32) {
    %c0_i32 = arith.constant 0 : i32
    %c0_i32_0 = arith.constant 0 : i32
    %c0_i32_1 = arith.constant 0 : i32
    return %c0_i32, %c0_i32_0 : i32, i32
  }
  func.func @transform_2(%arg0: i32) -> (i32, i32) {
    %c0_i32 = arith.constant 0 : i32
    %c0_i32_0 = arith.constant 0 : i32
    %c0_i32_1 = arith.constant 0 : i32
    return %c0_i32, %c0_i32_0 : i32, i32
  }
}

</mosaic_0001>

<bundles_post_ra>
// kernel: tpu_custom_call.1
= control target key start
LH: loop header
LB: loop body
LE: loop exit
PB: predicated region body
PF: predicated region fallthrough
CT: control target
= control target key end

     0   :  { %8 = vsyncpa [#allocation7], 0  ;;  %s539_s0 = inlined_call_operand.hbm [shape: f32[2,256], index: 0, kind: input, shape index: {}]   ;;  %s540_s1 = inlined_call_operand.vmem [shape: f32[2,1], index: 1, kind: output, shape index: {0}]   ;;  %s541_s2 = inlined_call_operand.vmem [shape: f32[2,1], index: 2, kind: output, shape index: {1}]  }
   0x1   :  { %10 = vsyncpa [#allocation7 + $0x1], 0  ;;  %s419_s9 = smov 0   ;;  %s421_s10 = smov 0  }
   0x2   :  { %s423_s11 = smov 0   ;;  %s425_s12 = smov 0  }
   0x3 LB: > { %s438_s13 = sadd.s32 4294967295, %s398_s12   ;;  %s441_s14 = sadd.s32 1, %s398_s12   ;;  %s398_s12 = sphi %s425_s12, %s549_s12   ;;  %s394_s11 = sphi %s423_s11, %s548_s11   ;;  %s390_s10 = sphi %s421_s10, %s547_s10   ;;  %s386_s9 = sphi %s419_s9, %s546_s9  }
   0x4   : > { %s20_s15 = ssub.s32 %s398_s12, %s441_s14  ;;  %s23_s16 = sadd.s32 1, %s394_s11 }
   0x5   : > { %p21_p0 = scmp.eq.s32.totalorder %s20_s15, 0  ;;  %p30_p1 = scmp.ne.s32.totalorder %s394_s11, %s390_s10 }
   0x6   : > { %p31_p2 = scmp.eq.s32.totalorder %s398_s12, 0  ;;  %p36_p3 = scmp.ne.s32.totalorder %s390_s10, %s386_s9 }
   0x7   : > { %s451_s17 = scalar_select %p21_p0, %s394_s11, %s23_s16  }
   0x8   : > { %p32_p4 = por %p31_p2, %p30_p1  ;;  %p37_p5 = scmp.eq.s32.totalorder %s438_s13, 0 }
   0x9   : > { %p289_p6 = scmp.lt.s32.totalorder %s398_s12, 2  ;;  %s102_s19 = sand.u32 1, %s394_s11  }
   0xa   : > { %p455_p7 = por %p37_p5, %p36_p3  ;;  %s275_s20 = sshll.u32 %s102_s19, 1 }
   0xb   : > { %s276_s21 = sshll.u32 %s398_s12, 5  ;;  %s106_s25 = scalar_lea.vmem [#allocation6], %s275_s20 }
   0xc   : > { %s464_s24 = scalar_lea.hbm %s539_s0, %s276_s21  ;;  %s113_s26 = sshll.u32 %s106_s25, 4  ;;  %s466_s26 = int_to_ptr.vmem [resolvable:$true] %s113_s26 }
   0xd   : > { %p468_p8 = pnand %p289_p6, %p32_p4  ;;  %s103_s28 = scalar_lea.sflag [#allocation7], %s102_s19 }
   0xe   : > { %s334_s29 = scalar_lea.hbm %s464_s24, 32  ;;  %s339_s4 = scalar_lea.hbm %s539_s0, 64 }
   0xf   : > { %p335_p11 = scmp.ne.s32.totalorder %s464_s24, %s334_s29  ;;  %p336_p12 = pneg %p468_p8 }
  0x10   : > { %p340_p1 = scmp.lt.u32.totalorder %s464_s24, %s539_s0  ;;  %p341_p2 = scmp.lt.u32.totalorder %s339_s4, %s334_s29 }
  0x11   : > { %p337_p13 = pnand %p336_p12, %p335_p11  ;;  %p343_p4 = scmp.lt.u32.totalorder %s334_s29, %s464_s24 }
  0x12   : > { %p342_p3 = por %p341_p2, %p340_p1 }
  0x13   : > { %p338_p0 = pneg %p337_p13 }
  0x14   : > { %p344_p5 = por %p343_p4, %p342_p3 }
  0x16   : > { %p345_p6 = pnand %p344_p5, %p338_p0 }
  0x18   : > { %348 = shalt.err (!%p345_p6)
}
  0x19   : > { %s349_s7 = scalar_lea.vmem %s466_s26, 32  ;;  %s400_s8 = smov [#allocation6]  }
  0x1a   : > { %p350_p11 = scmp.ne.s32.totalorder %s466_s26, %s349_s7  ;;  %s354_s9 = sshll.u32 %s400_s8, 4  ;;  %s355_s9 = int_to_ptr.vmem [resolvable:$false] %s354_s9 }
  0x1b   : > { %s356_s15 = scalar_lea.vmem %s355_s9, 64  ;;  %p357_p10 = scmp.lt.s32.totalorder %s466_s26, %s355_s9 }
  0x1c   : > { %p352_p13 = pnand %p350_p11, %p336_p12  ;;  %p358_p1 = scmp.lt.s32.totalorder %s356_s15, %s349_s7 }
  0x1e   : > { %p353_p9 = pneg %p352_p13  ;;  %p359_p2 = por %p358_p1, %p357_p10 }
  0x20   : > { %p360_p3 = pnand %p359_p2, %p353_p9 }
  0x22   : > { %363 = shalt.err (!%p360_p3)
}
  0x23   : > { %288 = dma.hbm_to_vmem [thread:$0]  (!%p468_p8), %s464_s24, 32, %s466_s26, %s103_s28  }
  0x24   : > { %p544_p0 = scmp.lt.s32.totalorder %s398_s12, 3  ;;  %p545_p4 = scmp.ge.s32.totalorder %s398_s12, 1 }
  0x26   : > { %p119_p12 = pnand %p545_p4, %p544_p0 }
  0x27   : > { %s124_s16 = sand.u32 (!%p119_p12), 1, %s390_s10  }
  0x28   : > { %122 = sbr.rel (%p119_p12) target bundleno = 519 (0x207), region = 24  ;;  %s278_s19 = sshll.u32 (!%p119_p12), %s124_s16, 1 }
  0x29   : > { %s125_s20 = scalar_lea.sflag (!%p119_p12), [#allocation7], %s124_s16  ;;  %s128_s21 = scalar_lea.vmem (!%p119_p12), [#allocation6], %s278_s19 }
  0x2f   : > { %381 = dma.done.wait (%p455_p7), %s125_s20, 32  }
  0x30   : > { %383 = vsyncadd (%p455_p7), %s125_s20, 4294967264  ;;  %p279_p9 = scmp.ne.s32.totalorder %s438_s13, 0 }
  0x31   : > { %vm148_vm0 = vcmask (!%p279_p9), 1024   ;;  %v401_v0 = vmov (!%p279_p9), -inf   ;;  %v402_v1 = vmov (!%p279_p9), 0.0  }
  0x32   : > { %147 = sbr.rel (%p279_p9) target bundleno = 57 (0x39), region = 32  ;;  %149 = vst.msk [vmem:[#allocation2] sm:$0x3] (!%p279_p9), %vm148_vm0, %v401_v0  ;;  %150 = vst.msk [vmem:[#allocation3] sm:$0x3] (!%p279_p9), %vm148_vm0, %v402_v1 }
  0x33   : > { %151 = vst.msk [vmem:[#allocation4] sm:$0x3] (!%p279_p9), %vm148_vm0, %v402_v1  ;;  %152 = vst.msk [vmem:[#allocation5] sm:$0x3] (!%p279_p9), %vm148_vm0, %v402_v1 }
  0x39 PF: > { %v153_v2 = vld [vmem:[%s128_s21] sm:$0x3]  ;;  %vm158_vm1 = vcmask 1041408   ;;  %v403_v4 = vmov 0   ;;  %v154_v5 = vld [vmem:[#allocation2] sm:$0x3] }
  0x3a   : > { %v159_v3 = vsel %vm158_vm1, %v153_v2, -inf  ;;  %325 = vset.pattern.permute.xlu0 %v403_v4  ;;  %vm194_vm2 = vcmask 1024   ;;  %v155_v22 = vld [vmem:[#allocation3] sm:$0x3]  ;;  %v156_v23 = vld [vmem:[#allocation4] sm:$0x3] }
  0x3b   : > { %160 = vmax.xlane.f32.xlu0 %v159_v3  ;;  %vm167_vm3 = vcmp.gt.f32.partialorder %v155_v22, 0.0  ;;  %v157_v34 = vld [vmem:[#allocation5] sm:$0x3]  ;;  %p280_p7 = scmp.ne.s32.totalorder %s438_s13, 1 }
  0xc8   : > { %v161_v6 = vpop.xlane.xlu0 %160 }
  0xc9   : > { %v162_v7 = vmax.f32 %v154_v5, %v161_v6 }
  0xcb   : > { %v163_v8 = vsub.f32 %v162_v7, %v154_v5  ;;  %207 = vst.msk [vmem:[#allocation2] sm:$0x3] %vm194_vm2, %v162_v7  ;;  %183 = vperm.xlu0 %325, %v162_v7  }
  0xcd   : > { %v164_v18 = vsub.f32 0.0, %v163_v8  ;;  %v170_v20 = vmul.f32 2.0, %v163_v8  ;;  %v172_v21 = vmul.f32 %v163_v8, %v163_v8  ;;  %v168_v24 = vmul.f32 %v163_v8, %v155_v22 }
  0xcf   : > { %v165_v19 = vmul.f32 1.442695, %v164_v18  ;;  %v171_v25 = vmul.f32 %v170_v20, %v156_v23  ;;  %v173_v26 = vmul.f32 %v172_v21, %v155_v22  ;;  %v169_v28 = vsel %vm167_vm3, %v168_v24, 0.0 }
  0xd0   : > { %v177_v33 = vsub.f32 %v156_v23, %v169_v28 }
  0xd1   : > { %v174_v29 = vsub.f32 %v171_v25, %v173_v26 }
  0xd3   : > { %v175_v35 = vsel %vm167_vm3, %v174_v29, 0.0 }
  0xd4   : > { %v179_v39 = vsub.f32 %v157_v34, %v175_v35 }
 0x14a   : > { %v184_v9 = vpop.permute.xlu0 %183 }
 0x14b   : > { %v186_v10 = vsub.f32 %v153_v2, %v184_v9 }
 0x14d   : > { %v187_v11 = vmul.f32 1.442695, %v186_v10 }
 0x14f   : > { %326 = vpow2.f32 %v187_v11 }
 0x150   : > { %328 = vpow2.f32 %v165_v19 }
 0x159   : > { %v327_v12 = vpop.eup %326 }
 0x15a   : > { %v190_v13 = vsel %vm158_vm1, %v327_v12, 0.0  ;;  %v189_v14 = vmul.f32 %v327_v12, %v186_v10  ;;  %v329_v27 = vpop.eup %328 }
 0x15b   : > { %191 = vadd.xlane.f32.xlu1 %v190_v13  ;;  %v176_v30 = vmul.f32 %v329_v27, %v155_v22  ;;  %v178_v36 = vmul.f32 %v329_v27, %v177_v33  ;;  %v180_v40 = vmul.f32 %v329_v27, %v179_v39 }
 0x15c   : > { %v196_v15 = vsel %vm158_vm1, %v189_v14, 0.0  ;;  %v201_v16 = vmul.f32 %v189_v14, %v186_v10 }
 0x15e   : > { %v202_v17 = vsel %vm158_vm1, %v201_v16, 0.0 }
 0x15f   : > { %197 = vadd.xlane.f32.xlu1 %v196_v15 }
 0x163   : > { %203 = vadd.xlane.f32.xlu1 %v202_v17 }
 0x1e8   : > { %v192_v31 = vpop.xlane.xlu1 %191 }
 0x1e9   : > { %v193_v32 = vadd.f32 %v192_v31, %v176_v30 }
 0x1eb   : > { %195 = vst.msk [vmem:[#allocation3] sm:$0x3] %vm194_vm2, %v193_v32 }
 0x1ec   : > { %v198_v37 = vpop.xlane.xlu1 %197 }
 0x1ed   : > { %v199_v38 = vadd.f32 %v198_v37, %v178_v36  ;;  %211 = sbr.rel (%p280_p7) target bundleno = 519 (0x207), region = 36 }
 0x1ef   : > { %200 = vst.msk [vmem:[#allocation4] sm:$0x3] %vm194_vm2, %v199_v38 }
 0x1f0   : > { %v204_v41 = vpop.xlane.xlu1 %203 }
 0x1f1   : > { %v205_v42 = vadd.f32 %v204_v41, %v180_v40 }
 0x1f2   : > { %v212_v43 = vld [vmem:[#allocation3] sm:$0x3] (!%p280_p7) }
 0x1f3   : > { %206 = vst.msk [vmem:[#allocation5] sm:$0x3] %vm194_vm2, %v205_v42  ;;  %330 = vrcp.f32 (!%p280_p7), %v212_v43 }
 0x1f4   : > { %332 = vlog2.f32 %v212_v43 }
 0x1f6   : > { %v213_v44 = vld [vmem:[#allocation4] sm:$0x3] }
 0x1fa   : > { %v216_v45 = vld [vmem:[#allocation5] sm:$0x3] }
 0x1fd   : > { %v331_v46 = vpop.eup %330 }
 0x1fe   : > { %v333_v47 = vpop.eup %332  ;;  %v215_v48 = vmul.f32 %v331_v46, %v213_v44  ;;  %v217_v49 = vmul.f32 %v331_v46, %v216_v45 }
 0x1ff   : > { %v219_v50 = vmul.f32 0.6931472, %v333_v47 }
 0x200   : > { %v223_v51 = vmul.f32 %v215_v48, %v215_v48 }
 0x201   : > { %v220_v52 = vsub.f32 %v219_v50, %v215_v48 }
 0x202   : > { %v224_v53 = vsub.f32 %v217_v49, %v223_v51 }
 0x203   : > { %v221_v54 = vmul.f32 1.442695, %v220_v52 }
 0x204   : > { %v225_v55 = vmul.f32 2.081369, %v224_v53 }
 0x205   : > { %222 = vst.msk [vmem:[%s540_s1] sm:$0x3] %vm194_vm2, %v221_v54 }
 0x206   : > { %226 = vst.msk [vmem:[%s541_s2] sm:$0x3] %vm194_vm2, %v225_v55 }
 0x207 PF: > { %p13_p8 = scmp.ge.s32.totalorder %s441_s14, 4   ;;  %s546_s9 = smov %s390_s10 }
 0x208   : > { %s547_s10 = smov %s394_s11  ;;  %s548_s11 = smov %s451_s17 }
 0x209   : > { %s549_s12 = smov %s441_s14  ;;  %15 = sbr.rel (!%p13_p8) target bundleno = 3 (0x3), region = 76 }
 0x210   :  { %244 = vsyncpa [#allocation7], 1 }
 0x211   :  { %246 = vsyncpa [#allocation7 + $0x1], 1 }

</bundles_post_ra>
